<compile_context>
chip_gen: v7x
topology: tpu7x:2x2x1
jax: 0.10.0
libtpu: 0.0.40
codegen_flags: <defaults>
</compile_context>

<pallas_src>
from functools import partial

import jax
import jax.numpy as jnp
from jax import lax
from jax.experimental import pallas as pl
from jax.experimental.pallas import tpu as pltpu


def _pick_block(total, cap):
    """Largest multiple of 128 that divides `total` and is <= cap (>=128)."""
    best = 128
    for c in range(128, min(cap, total) + 1, 128):
        if total % c == 0:
            best = c
    return best


def _gcn_body(a_ref, feat_ref, rin_ref, v_ref, w1_ref, b1_ref,
              part_ref, agg_ref, tile_k):
    """Grid = (row_tiles, k_tiles); k (reduction over A's columns) is last."""
    k = pl.program_id(1)

    @pl.when(k == 0)
    def _init():
        agg_ref[...] = jnp.zeros_like(agg_ref)

    # A tile stored as int8 (values exactly 0/1) -> upcast in-vreg to bf16 and
    # run a bf16 x bf16 MXU dot with an f32 accumulator.
    a_tile = a_ref[...].astype(jnp.bfloat16)
    start = pl.multiple_of(k * tile_k, tile_k)
    feat_tile = feat_ref[pl.ds(start, tile_k), :]          # VMEM-resident slice
    agg_ref[...] += jnp.dot(a_tile, feat_tile,
                            preferred_element_type=jnp.float32)

    @pl.when(k == pl.num_programs(1) - 1)
    def _finalize():
        # rsqrt(in-degree) row scaling (folded-out symmetric normalization).
        agg = agg_ref[...] * rin_ref[...]
        if w1_ref is not None:
            h1 = jnp.dot(agg, w1_ref[...], preferred_element_type=jnp.float32)
        else:
            h1 = agg
        h1 = jnp.maximum(h1 + b1_ref[...], 0.0)            # ReLU(GraphConv1)
        # Folded layer-2 aggregation + mean_nodes: this tile's share of v @ H1.
        contrib = jnp.dot(v_ref[...], h1, preferred_element_type=jnp.float32)
        part_ref[...] = contrib[None, :, :]


def _make_kernel(tile_k, project_in_kernel):
    if project_in_kernel:
        def kernel(a_ref, feat_ref, rin_ref, v_ref, w1_ref, b1_ref,
                   part_ref, agg_ref):
            _gcn_body(a_ref, feat_ref, rin_ref, v_ref, w1_ref, b1_ref,
                      part_ref, agg_ref, tile_k)
    else:
        def kernel(a_ref, feat_ref, rin_ref, v_ref, b1_ref,
                   part_ref, agg_ref):
            _gcn_body(a_ref, feat_ref, rin_ref, v_ref, None, b1_ref,
                      part_ref, agg_ref, tile_k)
    return kernel


@partial(jax.jit, static_argnames=("max_tile_m", "max_tile_k"))
def gcn_forward(adj, x, w1, b1, w2, b2, *, max_tile_m=512, max_tile_k=2048):
    """Forward pass of the 2-layer GCN with mean_nodes readout. Returns [1, C]."""
    n = adj.shape[0]
    in_feats = x.shape[1]
    h_feats = w1.shape[1]

    # Pad the node dimension only to a multiple of 128; pick row / reduction
    # blocks independently (reduction block as large as possible for DMA
    # efficiency, row block modest and >=2 tiles when possible for megacore).
    n_pad = pl.cdiv(n, 128) * 128
    tile_k = _pick_block(n_pad, max_tile_k)
    tile_m = _pick_block(n_pad, max_tile_m)
    if n_pad // tile_m < 2 and n_pad >= 256:
        tile_m = _pick_block(n_pad, n_pad // 2)
    num_row_tiles = n_pad // tile_m
    num_k_tiles = n_pad // tile_k

    # ---- Normalization / readout vector from the UNPADDED adjacency (one f32
    # view of A for degrees + the tiny GEMV; no padded f32 copy is written).
    adj32 = adj.astype(jnp.float32)
    deg_in = jnp.maximum(jnp.sum(adj32, axis=1, keepdims=True), 1.0)    # [n,1]
    deg_out = jnp.maximum(jnp.sum(adj32, axis=0, keepdims=True), 1.0)   # [1,n]
    rin = lax.rsqrt(deg_in)                                             # [n,1]
    rout = lax.rsqrt(deg_out)                                           # [1,n]
    # mean_nodes folded through layer 2 (exact): v = (rin^T A) * rout / n
    v = (jnp.dot(rin.T, adj32) * rout) / float(n)                       # [1,n]

    # Zero padding is exact: padded nodes have zero adjacency rows/cols, zero
    # features and zero readout weight v (rin pad value is irrelevant).
    rin_p = jnp.pad(rin, ((0, n_pad - n), (0, 0)), constant_values=1.0)
    v_p = jnp.pad(v, ((0, 0), (0, n_pad - n)))

    # Fold rsqrt(deg_out) into the source features; aggregate the narrower
    # representation (pre-project through W1 when in_feats > h_feats).
    xs = x.astype(jnp.float32) * rout.T                                 # [n,Fin]
    project_in_kernel = in_feats <= h_feats
    feat = xs if project_in_kernel else jnp.dot(xs, w1.astype(jnp.float32))
    feat_p = jnp.pad(feat, ((0, n_pad - n), (0, 0))).astype(jnp.bfloat16)
    fw = feat_p.shape[1]

    # Adjacency cast + padded to int8 exactly once (exact for 0/1 edges).
    a_i8 = jnp.pad(adj.astype(jnp.int8), ((0, n_pad - n), (0, n_pad - n)))

    # Deeper buffering on the A stream only when the grid is deep enough.
    grid_steps = num_row_tiles * num_k_tiles
    n_a_buf = 3 if grid_steps >= 4 else 2
    a_spec_kwargs = {}
    if n_a_buf == 3:
        a_spec_kwargs["pipeline_mode"] = pl.Buffered(3)

    in_specs = [
        pl.BlockSpec((tile_m, tile_k), lambda i, k: (i, k), **a_spec_kwargs),
        # Resident (projected) feature matrix: fetched once, sliced in-kernel.
        pl.BlockSpec((n_pad, fw), lambda i, k: (0, 0)),
        pl.BlockSpec((tile_m, 1), lambda i, k: (i, 0)),      # rsqrt(deg_in) rows
        pl.BlockSpec((1, tile_m), lambda i, k: (0, i)),      # readout vector slice
    ]
    args = [a_i8, feat_p, rin_p, v_p]
    if project_in_kernel:
        in_specs.append(pl.BlockSpec((in_feats, h_feats), lambda i, k: (0, 0)))
        args.append(w1.astype(jnp.float32))
    in_specs.append(pl.BlockSpec((1, h_feats), lambda i, k: (0, 0)))     # b1
    args.append(b1.astype(jnp.float32))

    kernel = _make_kernel(tile_k, project_in_kernel)

    # VMEM budget (v7x: 64 MiB physical / 32 MiB scoped default per TC).
    vmem_est = (n_a_buf * tile_m * tile_k                    # A buffers (int8)
                + n_pad * fw * 2                             # resident bf16 feat
                + tile_m * fw * 4                            # f32 accumulator
                + 4 * tile_m * 4                             # rin + v buffers
                + 2 * (in_feats * h_feats + 2 * h_feats) * 4)
    vmem_limit = int(min(max(2 * vmem_est + (4 << 20), 32 << 20), 64 << 20))

    part = pl.pallas_call(
        kernel,
        out_shape=jax.ShapeDtypeStruct((num_row_tiles, 1, h_feats), jnp.float32),
        grid=(num_row_tiles, num_k_tiles),
        in_specs=in_specs,
        out_specs=pl.BlockSpec((1, 1, h_feats), lambda i, k: (i, 0, 0)),
        scratch_shapes=[pltpu.VMEM((tile_m, fw), jnp.float32)],
        compiler_params=pltpu.CompilerParams(
            dimension_semantics=("parallel", "arbitrary"),
            vmem_limit_bytes=vmem_limit),
    )(*args)

    z = jnp.sum(part, axis=0)                 # [1, h_feats] == v @ H1
    return jnp.dot(z, w2) + b2                # [1, num_classes]


def _reference(adj, x, w1, b1, w2, b2):
    deg_in = jnp.maximum(adj.sum(axis=1, keepdims=True), 1.0)
    deg_out = jnp.maximum(adj.sum(axis=0, keepdims=True), 1.0)
    a_norm = adj / jnp.sqrt(deg_in) / jnp.sqrt(deg_out)
    h1 = jnp.maximum(a_norm @ x @ w1 + b1, 0.0)
    h2 = a_norm @ h1 @ w2 + b2
    return h2.mean(axis=0, keepdims=True)


def _run_case(key, n, in_feats, h_feats, num_classes, **tile_caps):
    k_adj, k_x, k_w1, k_b1, k_w2, k_b2 = jax.random.split(key, 6)

    # Random symmetric adjacency with self-loops (exact 0/1 values).
    raw = jax.random.bernoulli(k_adj, p=0.1, shape=(n, n)).astype(jnp.float32)
    adj = jnp.clip(raw + raw.T + jnp.eye(n, dtype=jnp.float32), 0.0, 1.0)

    x = jax.random.normal(k_x, (n, in_feats), jnp.float32)
    w1 = jax.random.normal(k_w1, (in_feats, h_feats), jnp.float32) * (
        (2.0 / (in_feats + h_feats)) ** 0.5)
    b1 = 0.1 * jax.random.normal(k_b1, (1, h_feats), jnp.float32)
    w2 = jax.random.normal(k_w2, (h_feats, num_classes), jnp.float32) * (
        (2.0 / (h_feats + num_classes)) ** 0.5)
    b2 = 0.1 * jax.random.normal(k_b2, (1, num_classes), jnp.float32)

    out = jax.block_until_ready(gcn_forward(adj, x, w1, b1, w2, b2, **tile_caps))
    ref = _reference(adj, x, w1, b1, w2, b2)
    assert out.shape == (1, num_classes)
    # Feature operand is bf16 on the MXU -> ~1e-3 relative rounding; A is exact.
    assert jnp.allclose(out, ref, atol=2e-2, rtol=2e-2), (out, ref)


if __name__ == "__main__":
    key = jax.random.PRNGKey(0)
    k1, k2, k3 = jax.random.split(key, 3)
    # Case 1: in_feats < h_feats -> W1 projection inside the kernel; 2 row tiles.
    _run_case(k1, n=200, in_feats=16, h_feats=32, num_classes=8)
    # Case 2: in_feats > h_feats -> features pre-projected before aggregation.
    _run_case(k2, n=96, in_feats=64, h_feats=32, num_classes=4)
    # Case 3: small tile caps force a 3x3 grid -> exercises the k-accumulation
    # loop, the resident-feature dynamic slice and the Buffered(3) A stream.
    _run_case(k3, n=333, in_feats=24, h_feats=40, num_classes=3,
              max_tile_m=128, max_tile_k=128)
    print("KERNEL_OK")
</pallas_src>

<mosaic_0001>
module attributes {stable_mosaic.version = 11 : i64} {
  func.func @kernel(%arg0: i32, %arg1: i32, %arg2: memref<128x256xi8, #tpu.memory_space<vmem>>, %arg3: memref<256x16xbf16, #tpu.memory_space<vmem>>, %arg4: memref<128x1xf32, #tpu.memory_space<vmem>>, %arg5: memref<1x128xf32, #tpu.memory_space<vmem>>, %arg6: memref<16x32xf32, #tpu.memory_space<vmem>>, %arg7: memref<1x32xf32, #tpu.memory_space<vmem>>, %arg8: memref<1x1x32xf32, #tpu.memory_space<vmem>>, %arg9: memref<128x16xf32, #tpu.memory_space<vmem>>) attributes {dimension_semantics = [#tpu.dimension_semantics<parallel>, #tpu.dimension_semantics<arbitrary>], iteration_bounds = array<i64: 2, 1>, scalar_prefetch = 0 : i64, scratch_operands = 1 : i64, tpu.core_type = #tpu.core_type<tc>, window_params = [{transform_indices = @transform_0, window_bounds = array<i64: 128, 256>}, {pipeline_mode = #tpu.pipeline_mode<synchronous>, transform_indices = @transform_1, window_bounds = array<i64: 256, 16>}, {transform_indices = @transform_2, window_bounds = array<i64: 128, 1>}, {transform_indices = @transform_3, window_bounds = array<i64: 1, 128>}, {pipeline_mode = #tpu.pipeline_mode<synchronous>, transform_indices = @transform_4, window_bounds = array<i64: 16, 32>}, {pipeline_mode = #tpu.pipeline_mode<synchronous>, transform_indices = @transform_5, window_bounds = array<i64: 1, 32>}, {transform_indices = @transform_6, window_bounds = array<i64: 1, 1, 32>}]} {
    %c0_i32 = arith.constant 0 : i32
    %0 = arith.cmpi eq, %arg1, %c0_i32 : i32
    %1 = arith.extui %0 : i1 to i32
    %c0_i32_0 = arith.constant 0 : i32
    %2 = arith.cmpi ne, %1, %c0_i32_0 : i32
    scf.if %2 {
      %cst_9 = arith.constant 0.000000e+00 : f32
      %16 = vector.broadcast %cst_9 : f32 to vector<128x16xf32>
      %c0_10 = arith.constant 0 : index
      %c0_11 = arith.constant 0 : index
      %17 = vector.load %arg9[%c0_10, %c0_11] : memref<128x16xf32, #tpu.memory_space<vmem>>, vector<128x16xf32>
      tpu.vector_store %arg9[%c0_10, %c0_11], %16 {strides = array<i32>} : memref<128x16xf32, #tpu.memory_space<vmem>>, vector<128x16xf32>,
    } else {
    }
    %c0 = arith.constant 0 : index
    %c0_1 = arith.constant 0 : index
    %3 = vector.load %arg2[%c0, %c0_1] : memref<128x256xi8, #tpu.memory_space<vmem>>, vector<128x256xi8>
    %4 = arith.sitofp %3 : vector<128x256xi8> to vector<128x256xbf16>
    %c256_i32 = arith.constant 256 : i32
    %5 = arith.muli %arg1, %c256_i32 : i32
    %6 = tpu.assume_multiple %5, 256 : i32
    %7 = arith.index_cast %6 : i32 to index
    %c0_2 = arith.constant 0 : index
    %8 = vector.load %arg3[%7, %c0_2] : memref<256x16xbf16, #tpu.memory_space<vmem>>, vector<256x16xbf16>
    %c0_3 = arith.constant 0 : index
    %c0_4 = arith.constant 0 : index
    %9 = vector.load %arg9[%c0_3, %c0_4] : memref<128x16xf32, #tpu.memory_space<vmem>>, vector<128x16xf32>
    %cst = arith.constant dense<0.000000e+00> : vector<128x16xf32>
    %10 = tpu.matmul %4, %8, %cst {dimension_numbers = #tpu.dot_dimension_numbers<[1], [0], [0], [1], [0, 0, 1, 1], [], []>} : vector<128x256xbf16>, vector<256x16xbf16>, vector<128x16xf32> -> vector<128x16xf32>
    %11 = arith.addf %9, %10 : vector<128x16xf32>
    %c0_5 = arith.constant 0 : index
    %c0_6 = arith.constant 0 : index
    %12 = vector.load %arg9[%c0_5, %c0_6] : memref<128x16xf32, #tpu.memory_space<vmem>>, vector<128x16xf32>
    tpu.vector_store %arg9[%c0_5, %c0_6], %11 {strides = array<i32>} : memref<128x16xf32, #tpu.memory_space<vmem>>, vector<128x16xf32>,
    %c0_i32_7 = arith.constant 0 : i32
    %13 = arith.cmpi eq, %arg1, %c0_i32_7 : i32
    %14 = arith.extui %13 : i1 to i32
    %c0_i32_8 = arith.constant 0 : i32
    %15 = arith.cmpi ne, %14, %c0_i32_8 : i32
    scf.if %15 {
      %c0_9 = arith.constant 0 : index
      %c0_10 = arith.constant 0 : index
      %16 = vector.load %arg9[%c0_9, %c0_10] : memref<128x16xf32, #tpu.memory_space<vmem>>, vector<128x16xf32>
      %c0_11 = arith.constant 0 : index
      %c0_12 = arith.constant 0 : index
      %17 = vector.load %arg4[%c0_11, %c0_12] : memref<128x1xf32, #tpu.memory_space<vmem>>, vector<128x1xf32>
      %18 = vector.broadcast %17 : vector<128x1xf32> to vector<128x16xf32>
      %19 = arith.mulf %16, %18 : vector<128x16xf32>
      %c0_13 = arith.constant 0 : index
      %c0_14 = arith.constant 0 : index
      %20 = vector.load %arg6[%c0_13, %c0_14] : memref<16x32xf32, #tpu.memory_space<vmem>>, vector<16x32xf32>
      %cst_15 = arith.constant dense<0.000000e+00> : vector<128x32xf32>
      %21 = tpu.matmul %19, %20, %cst_15 {dimension_numbers = #tpu.dot_dimension_numbers<[1], [0], [0], [1], [0, 0, 1, 1], [], []>} : vector<128x16xf32>, vector<16x32xf32>, vector<128x32xf32> -> vector<128x32xf32>
      %c0_16 = arith.constant 0 : index
      %c0_17 = arith.constant 0 : index
      %22 = vector.load %arg7[%c0_16, %c0_17] : memref<1x32xf32, #tpu.memory_space<vmem>>, vector<1x32xf32>
      %23 = vector.broadcast %22 : vector<1x32xf32> to vector<128x32xf32>
      %24 = arith.addf %21, %23 : vector<128x32xf32>
      %cst_18 = arith.constant 0.000000e+00 : f32
      %25 = vector.broadcast %cst_18 : f32 to vector<128x32xf32>
      %26 = arith.maximumf %24, %25 : vector<128x32xf32>
      %c0_19 = arith.constant 0 : index
      %c0_20 = arith.constant 0 : index
      %27 = vector.load %arg5[%c0_19, %c0_20] : memref<1x128xf32, #tpu.memory_space<vmem>>, vector<1x128xf32>
      %cst_21 = arith.constant dense<0.000000e+00> : vector<1x32xf32>
      %28 = tpu.matmul %27, %26, %cst_21 {dimension_numbers = #tpu.dot_dimension_numbers<[1], [0], [0], [1], [0, 0, 1, 1], [], []>} : vector<1x128xf32>, vector<128x32xf32>, vector<1x32xf32> -> vector<1x32xf32>
      %29 = vector.shape_cast %28 : vector<1x32xf32> to vector<1x1x32xf32>
      %c0_22 = arith.constant 0 : index
      %c0_23 = arith.constant 0 : index
      %c0_24 = arith.constant 0 : index
      %30 = vector.load %arg8[%c0_22, %c0_23, %c0_24] : memref<1x1x32xf32, #tpu.memory_space<vmem>>, vector<1x1x32xf32>
      tpu.vector_store %arg8[%c0_22, %c0_23, %c0_24], %29 {strides = array<i32>} : memref<1x1x32xf32, #tpu.memory_space<vmem>>, vector<1x1x32xf32>,
    } else {
    }
    return
  }
  func.func @transform_0(%arg0: i32, %arg1: i32) -> (i32, i32) {
    %c0_i32 = arith.constant 0 : i32
    return %arg0, %arg1 : i32, i32
  }
  func.func @transform_1(%arg0: i32, %arg1: i32) -> (i32, i32) {
    %c0_i32 = arith.constant 0 : i32
    %c0_i32_0 = arith.constant 0 : i32
    %c0_i32_1 = arith.constant 0 : i32
    return %c0_i32, %c0_i32_0 : i32, i32
  }
  func.func @transform_2(%arg0: i32, %arg1: i32) -> (i32, i32) {
    %c0_i32 = arith.constant 0 : i32
    %c0_i32_0 = arith.constant 0 : i32
    return %arg0, %c0_i32 : i32, i32
  }
  func.func @transform_3(%arg0: i32, %arg1: i32) -> (i32, i32) {
    %c0_i32 = arith.constant 0 : i32
    %c0_i32_0 = arith.constant 0 : i32
    return %c0_i32, %arg0 : i32, i32
  }
  func.func @transform_4(%arg0: i32, %arg1: i32) -> (i32, i32) {
    %c0_i32 = arith.constant 0 : i32
    %c0_i32_0 = arith.constant 0 : i32
    %c0_i32_1 = arith.constant 0 : i32
    return %c0_i32, %c0_i32_0 : i32, i32
  }
  func.func @transform_5(%arg0: i32, %arg1: i32) -> (i32, i32) {
    %c0_i32 = arith.constant 0 : i32
    %c0_i32_0 = arith.constant 0 : i32
    %c0_i32_1 = arith.constant 0 : i32
    return %c0_i32, %c0_i32_0 : i32, i32
  }
  func.func @transform_6(%arg0: i32, %arg1: i32) -> (i32, i32, i32) {
    %c0_i32 = arith.constant 0 : i32
    %c0_i32_0 = arith.constant 0 : i32
    %c0_i32_1 = arith.constant 0 : i32
    return %arg0, %c0_i32, %c0_i32_0 : i32, i32, i32
  }
}

</mosaic_0001>

<bundles_post_ra>
// kernel: gcn_forward.1
= control target key start
LH: loop header
LB: loop body
LE: loop exit
PB: predicated region body
PF: predicated region fallthrough
CT: control target
= control target key end

     0   :  { %s1509_s21 = smov 0   ;;  %s1511_s22 = smov 0   ;;  %s1734_s0 = inlined_call_operand.vmem [shape: s8[256,256], index: 0, kind: input, shape index: {}]   ;;  %s1735_s1 = inlined_call_operand.vmem [shape: bf16[256,16], index: 1, kind: input, shape index: {}]   ;;  %s1736_s2 = inlined_call_operand.vmem [shape: f32[256,1], index: 2, kind: input, shape index: {}]   ;;  %s1737_s3 = inlined_call_operand.vmem [shape: f32[1,256], index: 3, kind: input, shape index: {}]   ;;  %s1738_s4 = inlined_call_operand.vmem [shape: f32[16,32], index: 4, kind: input, shape index: {}]   ;;  %s1739_s5 = inlined_call_operand.vmem [shape: f32[1,32], index: 5, kind: input, shape index: {}]   ;;  %s1740_s6 = inlined_call_operand.vmem [shape: f32[2,1,32], index: 6, kind: output, shape index: {}]  }
   0x1   :  { %s1513_s23 = smov 0  }
   0x2 LB: > { %s28_s24 = sadd.s32 1, %s1464_s22  ;;  %p1152_p0 = scmp.ge.s32.totalorder %s1468_s23, 1  ;;  %s1468_s23 = sphi %s1513_s23, %s16_s23   ;;  %s1464_s22 = sphi %s1511_s22, %s1742_s22   ;;  %s1460_s21 = sphi %s1509_s21, %s1741_s21  }
   0x3   : > { %p30_p1 = scmp.ge.s32.totalorder %s28_s24, 2  ;;  %p252_p2 = scmp.lt.s32.totalorder %s1468_s23, 3 }
   0x5   : > { %s1744_s24 = smov (%p30_p1, %s28_s24), 0  ;;  %p253_p3 = pnand %p1152_p0, %p252_p2 }
   0x6   : > { %v1430_v0 = vld [vmem:[%s1735_s1 + $0x40] sm:$0xff] (!%p253_p3)   ;;  %s1153_s27 = sshll.u32 (!%p253_p3), %s1460_s21, 2  ;;  %v1432_v2 = vld [vmem:[%s1735_s1 + $0x48] sm:$0xff] (!%p253_p3)   ;;  %v1434_v4 = vld [vmem:[%s1735_s1 + $0x50] sm:$0xff] (!%p253_p3)   ;;  %s1156_s12 = sshll.u32 (!%p253_p3), %s1460_s21, 4  ;;  %v1470_v5 = vmov (!%p253_p3), 0  }
   0x7   : > { %256 = sbr.rel (%p253_p3) target bundleno = 755 (0x2f3), region = 44  ;;  %v1431_v1 = vld [vmem:[%s1735_s1] sm:$0xff] (!%p253_p3)   ;;  %p295_p4 = scmp.lt.s32.totalorder (!%p253_p3), %s1153_s27, 7  ;;  %1194 = vmatprep.subr.bf16.mxu0 (!%p253_p3), %v1430_v0  ;;  %1384 = vmatprep.subr.bf16.mxu1 (!%p253_p3), %v1430_v0  ;;  %v1433_v3 = vld [vmem:[%s1735_s1 + $0x8] sm:$0xff] (!%p253_p3)   ;;  %v1435_v6 = vld [vmem:[%s1735_s1 + $0x10] sm:$0xff] (!%p253_p3)   ;;  %vm322_vm0 = vcmask (!%p253_p3), 130048  }
   0x8   : > { %1195 = vmatpush3.bf16.msra.mxu0 (!%p253_p3), %v1431_v1  ;;  %1392 = vmatpush3.bf16.msra.mxu1 (!%p253_p3), %v1431_v1  ;;  %p306_p5 = scmp.lt.s32.totalorder (!%p253_p3), %s1156_s12, 31  ;;  %v1436_v7 = vld [vmem:[%s1735_s1 + $0x58] sm:$0xff] (!%p253_p3)   ;;  %v1438_v9 = vld [vmem:[%s1735_s1 + $0x60] sm:$0xff] (!%p253_p3)   ;;  %v1440_v11 = vld [vmem:[%s1735_s1 + $0x68] sm:$0xff] (!%p253_p3)   ;;  %v1471_v57 = vmov (!%p253_p3), 0.0   ;;  %vm1473_vm1 = vmmov (!%p253_p3), 0  }
   0x9   : > { %1196 = vmatprep.subr.bf16.mxu0 (!%p253_p3), %v1432_v2  ;;  %1385 = vmatprep.subr.bf16.mxu1 (!%p253_p3), %v1432_v2  ;;  %v1437_v8 = vld [vmem:[%s1735_s1 + $0x18] sm:$0xff] (!%p253_p3)   ;;  %v1439_v10 = vld [vmem:[%s1735_s1 + $0x20] sm:$0xff] (!%p253_p3)   ;;  %v1441_v16 = vld [vmem:[%s1735_s1 + $0x28] sm:$0xff] (!%p253_p3)   ;;  %323 = vst.msk [vmem:[#allocation2] sm:$0xff] (!%p253_p3), %vm322_vm0, %v1471_v57  ;;  %p311_p6 = scmp.lt.s32.totalorder (!%p253_p3), %s1460_s21, 1  ;;  %vm1062_vm2 = vcmask (!%p253_p3), 253952  }
   0xa   : > { %1428 = vset.pattern.permute.xlu0 (!%p253_p3), %v1470_v5  ;;  %1429 = vset.pattern.permute.xlu1 (!%p253_p3), %v1470_v5  ;;  %v1442_v19 = vld [vmem:[%s1735_s1 + $0x70] sm:$0xff] (!%p253_p3)   ;;  %v1444_v23 = vld [vmem:[%s1735_s1 + $0x78] sm:$0xff] (!%p253_p3)   ;;  %324 = vst.msk [vmem:[#allocation2 + $0x8] sm:$0xff] (!%p253_p3), %vm322_vm0, %v1471_v57  ;;  %325 = vst.msk [vmem:[#allocation2 + $0x10] sm:$0xff] (!%p253_p3), %vm322_vm0, %v1471_v57 }
   0xb   : > { %v1443_v20 = vld [vmem:[%s1735_s1 + $0x30] sm:$0xff] (!%p253_p3)   ;;  %v1445_v24 = vld [vmem:[%s1735_s1 + $0x38] sm:$0xff] (!%p253_p3)   ;;  %326 = vst.msk [vmem:[#allocation2 + $0x18] sm:$0xff] (!%p253_p3), %vm322_vm0, %v1471_v57  ;;  %327 = vst.msk [vmem:[#allocation2 + $0x20] sm:$0xff] (!%p253_p3), %vm322_vm0, %v1471_v57 }
   0xc   : > { %1197 = vmatpush3.bf16.msra.mxu0 (!%p253_p3), %v1433_v3  ;;  %1393 = vmatpush3.bf16.msra.mxu1 (!%p253_p3), %v1433_v3  ;;  %328 = vst.msk [vmem:[#allocation2 + $0x28] sm:$0xff] (!%p253_p3), %vm322_vm0, %v1471_v57  ;;  %329 = vst.msk [vmem:[#allocation2 + $0x30] sm:$0xff] (!%p253_p3), %vm322_vm0, %v1471_v57  ;;  %v773_v58 = vld [vmem:[%s1738_s4] sm:$0xff] (!%p253_p3)  ;;  %v774_v59 = vld [vmem:[%s1738_s4 + $0x8] sm:$0xff] (!%p253_p3) }
   0xd   : > { %1198 = vmatprep.subr.bf16.mxu0 (!%p253_p3), %v1434_v4  ;;  %1386 = vmatprep.subr.bf16.mxu1 (!%p253_p3), %v1434_v4  ;;  %330 = vst.msk [vmem:[#allocation2 + $0x38] sm:$0xff] (!%p253_p3), %vm322_vm0, %v1471_v57  ;;  %331 = vst.msk [vmem:[#allocation2 + $0x40] sm:$0xff] (!%p253_p3), %vm322_vm0, %v1471_v57  ;;  %v1356_v60 = vpack.c.bf16 (!%p253_p3), %v774_v59, %v773_v58 }
   0xe   : > { %s1746_s27 = smov (!%p295_p4, %s1153_s27), 7  ;;  %s1748_s12 = smov (!%p306_p5, %s1156_s12), 31  ;;  %332 = vst.msk [vmem:[#allocation2 + $0x48] sm:$0xff] %vm322_vm0, %v1471_v57  ;;  %333 = vst.msk [vmem:[#allocation2 + $0x50] sm:$0xff] %vm322_vm0, %v1471_v57 }
   0xf   : > { %s1193_s17 = sshll.u32 %s1746_s27, 4  ;;  %s1157_s27 = sshll.u32 %s1748_s12, 3  ;;  %334 = vst.msk [vmem:[#allocation2 + $0x58] sm:$0xff] %vm322_vm0, %v1471_v57  ;;  %335 = vst.msk [vmem:[#allocation2 + $0x60] sm:$0xff] %vm322_vm0, %v1471_v57 }
  0x10   : > { %1199 = vmatpush3.bf16.msra.mxu0 %v1435_v6  ;;  %1394 = vmatpush3.bf16.msra.mxu1 %v1435_v6  ;;  %s1561_s29 = scalar_lea.vmem %s1734_s0, %s1193_s17  ;;  %s1573_s13 = scalar_lea.vmem %s1736_s2, %s1157_s27  ;;  %336 = vst.msk [vmem:[#allocation2 + $0x68] sm:$0xff] %vm322_vm0, %v1471_v57  ;;  %337 = vst.msk [vmem:[#allocation2 + $0x70] sm:$0xff] %vm322_vm0, %v1471_v57  ;;  %v400_v62 = vld [vmem:[#allocation2] sm:$0xff] }
  0x11   : > { %1200 = vmatprep.subr.bf16.mxu0 %v1436_v7  ;;  %1387 = vmatprep.subr.bf16.mxu1 %v1436_v7  ;;  %v340_v12 = vld [vmem:[%s1561_s29 + $0x8] sm:$0xff]  ;;  %v1576_v14 = vld [vmem:[%s1561_s29 + $0x38] sm:$0xff]  ;;  %v661_v17 = vld [vmem:[%s1573_s13] sm:$0xff]  ;;  %338 = vst.msk [vmem:[#allocation2 + $0x78] sm:$0xff] %vm322_vm0, %v1471_v57  ;;  %s1750_s21 = smov (!%p311_p6, %s1460_s21), 1 }
  0x12   : > { %v348_v13 = vunpack.c.l.s8.bf16 %v340_v12  ;;  %v362_v15 = vunpack.c.h.s8.bf16 %v1576_v14  ;;  %v663_v18 = vld [vmem:[%s1573_s13 + $0x10] sm:$0xff]  ;;  %679 = vperm.xlu0 %1428, %v661_v17   ;;  %v662_v21 = vld [vmem:[%s1573_s13 + $0x8] sm:$0xff]  ;;  %v664_v22 = vld [vmem:[%s1573_s13 + $0x18] sm:$0xff]  ;;  %v350_v30 = vunpack.c.h.s8.bf16 %v340_v12  ;;  %v360_v55 = vunpack.c.l.s8.bf16 %v1576_v14  ;;  %s313_s11 = scalar_lea.vmem %s1737_s3, %s1750_s21  ;;  %s316_s14 = scalar_lea.vmem %s1740_s6, %s1750_s21 }
  0x13   : > { %689 = vperm.xlu1 %1429, %v663_v18   ;;  %v339_v25 = vld [vmem:[%s1561_s29] sm:$0xff]  ;;  %v666_v27 = vld [vmem:[%s1573_s13 + $0x28] sm:$0xff]  ;;  %v345_v28 = vld [vmem:[%s1561_s29 + $0x30] sm:$0xff] }
  0x14   : > { %1201 = vmatpush3.bf16.msra.mxu0 %v1437_v8  ;;  %1395 = vmatpush3.bf16.msra.mxu1 %v1437_v8  ;;  %v665_v26 = vld [vmem:[%s1573_s13 + $0x20] sm:$0xff]  ;;  %v347_v29 = vunpack.c.l.s8.bf16 %v339_v25  ;;  %v361_v31 = vunpack.c.h.s8.bf16 %v345_v28  ;;  %v667_v32 = vld [vmem:[%s1573_s13 + $0x30] sm:$0xff]  ;;  %v668_v33 = vld [vmem:[%s1573_s13 + $0x38] sm:$0xff]  ;;  %v349_v37 = vunpack.c.h.s8.bf16 %v339_v25  ;;  %v359_v56 = vunpack.c.l.s8.bf16 %v345_v28 }
  0x15   : > { %1202 = vmatprep.subr.bf16.mxu0 %v1438_v9  ;;  %1388 = vmatprep.subr.bf16.mxu1 %v1438_v9  ;;  %v669_v34 = vld [vmem:[%s1573_s13 + $0x40] sm:$0xff]  ;;  %v342_v35 = vld [vmem:[%s1561_s29 + $0x18] sm:$0xff]  ;;  %v670_v36 = vld [vmem:[%s1573_s13 + $0x48] sm:$0xff] }
  0x16   : > { %544 = vmatprep.mubr.bf16.mxu0 %v348_v13  ;;  %600 = vmatprep.mubr.bf16.mxu1 %v362_v15  ;;  %v352_v38 = vunpack.c.l.s8.bf16 %v342_v35  ;;  %v671_v39 = vld [vmem:[%s1573_s13 + $0x50] sm:$0xff]  ;;  %v672_v40 = vld [vmem:[%s1573_s13 + $0x58] sm:$0xff]  ;;  %v673_v42 = vld [vmem:[%s1573_s13 + $0x60] sm:$0xff]  ;;  %v354_v45 = vunpack.c.h.s8.bf16 %v342_v35 }
  0x17   : > { %684 = vperm.xlu0 %1428, %v662_v21   ;;  %694 = vperm.xlu1 %1429, %v664_v22   ;;  %v341_v41 = vld [vmem:[%s1561_s29 + $0x10] sm:$0xff]  ;;  %v674_v43 = vld [vmem:[%s1573_s13 + $0x68] sm:$0xff]  ;;  %v676_v47 = vld [vmem:[%s1573_s13 + $0x78] sm:$0xff] }
  0x18   : > { %1203 = vmatpush3.bf16.msra.mxu0 %v1439_v10  ;;  %1396 = vmatpush3.bf16.msra.mxu1 %v1439_v10  ;;  %v351_v44 = vunpack.c.l.s8.bf16 %v341_v41  ;;  %v675_v46 = vld [vmem:[%s1573_s13 + $0x70] sm:$0xff]  ;;  %v344_v48 = vld [vmem:[%s1561_s29 + $0x28] sm:$0xff]  ;;  %v353_v49 = vunpack.c.h.s8.bf16 %v341_v41  ;;  %v343_v51 = vld [vmem:[%s1561_s29 + $0x20] sm:$0xff] }
  0x19   : > { %1204 = vmatprep.subr.bf16.mxu0 %v1440_v11  ;;  %1389 = vmatprep.subr.bf16.mxu1 %v1440_v11  ;;  %v356_v50 = vunpack.c.l.s8.bf16 %v344_v48  ;;  %v355_v52 = vunpack.c.l.s8.bf16 %v343_v51  ;;  %v358_v53 = vunpack.c.h.s8.bf16 %v344_v48  ;;  %v357_v54 = vunpack.c.h.s8.bf16 %v343_v51  ;;  %v414_v3 = vld [vmem:[#allocation2 + $0x70] sm:$0xff]  ;;  %v401_v5 = vld [vmem:[#allocation2 + $0x8] sm:$0xff]  ;;  %v415_v11 = vld [vmem:[#allocation2 + $0x78] sm:$0xff] }
  0x1a   : > { %v404_v35 = vld [vmem:[#allocation2 + $0x20] sm:$0xff] }
  0x1b   : > { %699 = vperm.xlu0 %1428, %v665_v26   ;;  %704 = vperm.xlu1 %1429, %v666_v27  }
  0x1c   : > { %1205 = vmatpush3.bf16.msra.mxu0 %v1441_v16  ;;  %1397 = vmatpush3.bf16.msra.mxu1 %v1441_v16 }
  0x1d   : > { %1206 = vmatprep.subr.bf16.mxu0 %v1442_v19  ;;  %1390 = vmatprep.subr.bf16.mxu1 %v1442_v19  ;;  %v402_v19 = vld [vmem:[#allocation2 + $0x10] sm:$0xff] }
  0x1f   : > { %709 = vperm.xlu0 %1428, %v667_v32   ;;  %714 = vperm.xlu1 %1429, %v668_v33  }
  0x20   : > { %1207 = vmatpush3.bf16.msra.mxu0 %v1443_v20  ;;  %1398 = vmatpush3.bf16.msra.mxu1 %v1443_v20 }
  0x21   : > { %1208 = vmatprep.subr.bf16.mxu0 %v1444_v23  ;;  %1391 = vmatprep.subr.bf16.mxu1 %v1444_v23  ;;  %v403_v23 = vld [vmem:[#allocation2 + $0x18] sm:$0xff] }
  0x23   : > { %719 = vperm.xlu0 %1428, %v669_v34   ;;  %724 = vperm.xlu1 %1429, %v670_v36  }
  0x24   : > { %1209 = vmatpush3.bf16.msra.mxu0 %v1445_v24  ;;  %1399 = vmatpush3.bf16.msra.mxu1 %v1445_v24 }
  0x25   : > { %1357 = vmatprep.subr.bf16.mxu1 %v1356_v60 }
  0x27   : > { %545 = vmatmul.mubr.bf16.vlgmr.msra.gmra.mrb[0].mxu0 %v347_v29  ;;  %601 = vmatmul.mubr.bf16.vlgmr.msra.gmra.mrb[0].mxu1 %v361_v31 }
  0x28   : > { %552 = vmatprep.mubr.bf16.mxu0 %v350_v30  ;;  %729 = vperm.xlu0 %1428, %v671_v39   ;;  %v405_v39 = vld [vmem:[#allocation2 + $0x28] sm:$0xff] }
  0x29   : > { %734 = vperm.xlu1 %1429, %v672_v40   ;;  %1359 = vmatpush3.bf16.msra.mxu1 %v1356_v60 }
  0x2c   : > { %739 = vperm.xlu0 %1428, %v673_v42  }
  0x2d   : > { %744 = vperm.xlu1 %1429, %v674_v43  }
  0x2f   : > { %553 = vmatmul.mubr.bf16.gmra.mrb[4].mxu0 %v349_v37 }
  0x30   : > { %560 = vmatprep.mubr.bf16.mxu0 %v352_v38  ;;  %749 = vperm.xlu0 %1428, %v675_v46  }
  0x31   : > { %754 = vperm.xlu1 %1429, %v676_v47  }
  0x37   : > { %561 = vmatmul.mubr.bf16.gmra.mrb[8].mxu0 %v351_v44 }
  0x38   : > { %568 = vmatprep.mubr.bf16.mxu0 %v354_v45 }
  0x3f   : > { %569 = vmatmul.mubr.bf16.gmra.mrb[12].mxu0 %v353_v49 }
  0x40   : > { %576 = vmatprep.mubr.bf16.mxu0 %v356_v50  ;;  %v406_v50 = vld [vmem:[#allocation2 + $0x30] sm:$0xff] }
  0x47   : > { %577 = vmatmul.mubr.bf16.gmra.mrb[16].mxu0 %v355_v52 }
  0x48   : > { %584 = vmatprep.mubr.bf16.mxu0 %v358_v53 }
  0x4f   : > { %585 = vmatmul.mubr.bf16.gmra.mrb[20].mxu0 %v357_v54  ;;  %v407_v54 = vld [vmem:[#allocation2 + $0x38] sm:$0xff] }
  0x50   : > { %592 = vmatprep.mubr.bf16.mxu0 %v360_v55 }
  0x57   : > { %593 = vmatmul.mubr.bf16.gmra.mrb[24].mxu0 %v359_v56 }
  0x91   : > { %v680_v18 = vpop.permute.xlu0 %679 }
  0x92   : > { %v690_v34 = vpop.permute.xlu1 %689 }
  0x96   : > { %v685_v30 = vpop.permute.xlu0 %684  ;;  %v695_v46 = vpop.permute.xlu1 %694 }
  0x9a   : > { %v700_v59 = vpop.permute.xlu0 %699 }
  0xfa   : > { %v1210_v61 = vpop.f32.mrb[0].mxu0  ;;  %v1252_v0 = vpop.f32.mrb[0].mxu1 }
  0xfb   : > { %v1211_v63 = vpop.f32.mrb[1].mxu0  ;;  %v1253_v4 = vpop.f32.mrb[1].mxu1 }
  0xfc   : > { %v1212_v1 = vadd.f32 %v1211_v63, %v1210_v61  ;;  %v1213_v2 = vpop.f32.mrb[2].mxu0  ;;  %v1254_v7 = vadd.f32 %v1253_v4, %v1252_v0  ;;  %v1255_v8 = vpop.f32.mrb[2].mxu1 }
  0xfd   : > { %v1214_v6 = vpop.f32.mrb[3].mxu0  ;;  %v1256_v12 = vpop.f32.mrb[3].mxu1 }
  0xfe   : > { %v609_v9 = vadd.f32 %v1212_v1, %v400_v62  ;;  %v1215_v10 = vadd.f32 %v1214_v6, %v1213_v2  ;;  %v623_v13 = vadd.f32 %v1254_v7, %v414_v3  ;;  %v1257_v14 = vadd.f32 %v1256_v12, %v1255_v8  ;;  %v705_v63 = vpop.permute.xlu1 %704  ;;  %v408_v3 = vld [vmem:[#allocation2 + $0x40] sm:$0xff]  ;;  %v409_v7 = vld [vmem:[#allocation2 + $0x48] sm:$0xff] }
 0x100   : > { %626 = vst.msk [vmem:[#allocation2] sm:$0xff] %vm322_vm0, %v609_v9  ;;  %v610_v15 = vadd.f32 %v1215_v10, %v401_v5  ;;  %640 = vst.msk [vmem:[#allocation2 + $0x70] sm:$0xff] %vm322_vm0, %v623_v13  ;;  %v624_v16 = vadd.f32 %v1257_v14, %v415_v11  ;;  %v710_v11 = vpop.permute.xlu0 %709 }
 0x102   : > { %627 = vst.msk [vmem:[#allocation2 + $0x8] sm:$0xff] %vm322_vm0, %v610_v15  ;;  %v1216_v17 = vpop.f32.mrb[4].mxu0  ;;  %641 = vst.msk [vmem:[#allocation2 + $0x78] sm:$0xff] %vm322_vm0, %v624_v16  ;;  %v715_v15 = vpop.permute.xlu1 %714 }
 0x103   : > { %v1217_v20 = vpop.f32.mrb[5].mxu0 }
 0x104   : > { %v1218_v21 = vadd.f32 %v1217_v20, %v1216_v17  ;;  %v1219_v22 = vpop.f32.mrb[6].mxu0 }
 0x105   : > { %v1220_v24 = vpop.f32.mrb[7].mxu0 }
 0x106   : > { %v611_v25 = vadd.f32 %v1218_v21, %v402_v19  ;;  %v1221_v26 = vadd.f32 %v1220_v24, %v1219_v22  ;;  %v410_v19 = vld [vmem:[#allocation2 + $0x50] sm:$0xff] }
 0x107   : > { %v645_v27 = vld [vmem:[#allocation2] sm:$0xff] }
 0x108   : > { %v757_v28 = vmul.f32 %v680_v18, %v645_v27  ;;  %628 = vst.msk [vmem:[#allocation2 + $0x10] sm:$0xff] %vm322_vm0, %v611_v25  ;;  %v612_v29 = vadd.f32 %v1221_v26, %v403_v23  ;;  %v411_v23 = vld [vmem:[#allocation2 + $0x58] sm:$0xff]  ;;  %v720_v25 = vpop.permute.xlu0 %719 }
 0x109   : > { %v646_v31 = vld [vmem:[#allocation2 + $0x8] sm:$0xff] }
 0x10a   : > { %v758_v32 = vmul.f32 %v685_v30, %v646_v31  ;;  %629 = vst.msk [vmem:[#allocation2 + $0x18] sm:$0xff] %vm322_vm0, %v612_v29  ;;  %v1222_v33 = vpop.f32.mrb[8].mxu0  ;;  %1297 = vmatprep.mubr.msk.f32.mxu1 %vm322_vm0, %v757_v28  ;;  %v725_v31 = vpop.permute.xlu1 %724 }
 0x10b   : > { %v1223_v36 = vpop.f32.mrb[9].mxu0 }
 0x10c   : > { %v1224_v37 = vadd.f32 %v1223_v36, %v1222_v33  ;;  %v1225_v38 = vpop.f32.mrb[10].mxu0  ;;  %1298 = vmatmul.mubr.msk.f32.vlgmr.msra.gmra.mrb[4].mxu1 %vm322_vm0, %v758_v32 }
 0x10d   : > { %v1226_v40 = vpop.f32.mrb[11].mxu0 }
 0x10e   : > { %v613_v41 = vadd.f32 %v1224_v37, %v404_v35  ;;  %v1227_v42 = vadd.f32 %v1226_v40, %v1225_v38  ;;  %v412_v35 = vld [vmem:[#allocation2 + $0x60] sm:$0xff]  ;;  %v730_v37 = vpop.permute.xlu0 %729  ;;  %v413_v40 = vld [vmem:[#allocation2 + $0x68] sm:$0xff] }
 0x10f   : > { %v647_v43 = vld [vmem:[#allocation2 + $0x10] sm:$0xff] }
 0x110   : > { %v759_v44 = vmul.f32 %v690_v34, %v647_v43  ;;  %630 = vst.msk [vmem:[#allocation2 + $0x20] sm:$0xff] %vm322_vm0, %v613_v41  ;;  %v614_v45 = vadd.f32 %v1227_v42, %v405_v39 }
 0x111   : > { %v648_v47 = vld [vmem:[#allocation2 + $0x18] sm:$0xff] }
 0x112   : > { %v760_v48 = vmul.f32 %v695_v46, %v648_v47  ;;  %631 = vst.msk [vmem:[#allocation2 + $0x28] sm:$0xff] %vm322_vm0, %v614_v45  ;;  %v1228_v49 = vpop.f32.mrb[12].mxu0  ;;  %1300 = vmatprep.mubr.msk.f32.mxu1 %vm322_vm0, %v759_v44  ;;  %v735_v44 = vpop.permute.xlu1 %734 }
 0x113   : > { %v1229_v51 = vpop.f32.mrb[13].mxu0 }
 0x114   : > { %v1230_v52 = vadd.f32 %v1229_v51, %v1228_v49  ;;  %v1231_v53 = vpop.f32.mrb[14].mxu0  ;;  %1301 = vmatmul.mubr.msk.f32.gmra.mrb[6].mxu1 %vm322_vm0, %v760_v48  ;;  %v740_v49 = vpop.permute.xlu0 %739 }
 0x115   : > { %v1232_v55 = vpop.f32.mrb[15].mxu0 }
 0x116   : > { %v615_v56 = vadd.f32 %v1230_v52, %v406_v50  ;;  %v1233_v58 = vadd.f32 %v1232_v55, %v1231_v53  ;;  %v745_v51 = vpop.permute.xlu1 %744 }
 0x117   : > { %v649_v60 = vld [vmem:[#allocation2 + $0x20] sm:$0xff] }
 0x118   : > { %632 = vst.msk [vmem:[#allocation2 + $0x30] sm:$0xff] %vm322_vm0, %v615_v56  ;;  %v616_v61 = vadd.f32 %v1233_v58, %v407_v54  ;;  %v761_v62 = vmul.f32 %v700_v59, %v649_v60  ;;  %v750_v53 = vpop.permute.xlu0 %749  ;;  %v659_v54 = vld [vmem:[#allocation2 + $0x70] sm:$0xff] }
 0x119   : > { %v650_v0 = vld [vmem:[#allocation2 + $0x28] sm:$0xff]  ;;  %v771_v59 = vmul.f32 %v750_v53, %v659_v54 }
 0x11a   : > { %633 = vst.msk [vmem:[#allocation2 + $0x38] sm:$0xff] %vm322_vm0, %v616_v61  ;;  %v1234_v1 = vpop.f32.mrb[16].mxu0  ;;  %1303 = vmatprep.mubr.msk.f32.mxu1 %vm322_vm0, %v761_v62  ;;  %v762_v2 = vmul.f32 %v705_v63, %v650_v0  ;;  %v755_v60 = vpop.permute.xlu1 %754  ;;  %v660_v61 = vld [vmem:[#allocation2 + $0x78] sm:$0xff]  ;;  %v1472_v63 = vmov 0.0|0.0   ;;  %v1692_v0 = vld [vmem:[%s1739_s5] ss:$0 sm:$0xff] }
 0x11b   : > { %v1235_v4 = vpop.f32.mrb[17].mxu0  ;;  %v772_v62 = vmul.f32 %v755_v60, %v660_v61  ;;  %1360 = vmatprep.subr.bf16.mxu1 %v1472_v63 }
 0x11c   : > { %v1236_v5 = vadd.f32 %v1235_v4, %v1234_v1  ;;  %v1237_v6 = vpop.f32.mrb[18].mxu0  ;;  %1304 = vmatmul.mubr.msk.f32.gmra.mrb[8].mxu1 %vm322_vm0, %v762_v2 }
 0x11d   : > { %v1238_v8 = vpop.f32.mrb[19].mxu0 }
 0x11e   : > { %v617_v9 = vadd.f32 %v1236_v5, %v408_v3  ;;  %v1239_v10 = vadd.f32 %v1238_v8, %v1237_v6 }
 0x11f   : > { %v651_v12 = vld [vmem:[#allocation2 + $0x30] sm:$0xff] }
 0x120   : > { %634 = vst.msk [vmem:[#allocation2 + $0x40] sm:$0xff] %vm322_vm0, %v617_v9  ;;  %v618_v13 = vadd.f32 %v1239_v10, %v409_v7  ;;  %v763_v14 = vmul.f32 %v710_v11, %v651_v12 }
 0x121   : > { %v652_v16 = vld [vmem:[#allocation2 + $0x38] sm:$0xff] }
 0x122   : > { %635 = vst.msk [vmem:[#allocation2 + $0x48] sm:$0xff] %vm322_vm0, %v618_v13  ;;  %v1240_v17 = vpop.f32.mrb[20].mxu0  ;;  %1306 = vmatprep.mubr.msk.f32.mxu1 %vm322_vm0, %v763_v14  ;;  %v764_v18 = vmul.f32 %v715_v15, %v652_v16 }
 0x123   : > { %v1241_v20 = vpop.f32.mrb[21].mxu0 }
 0x124   : > { %v1242_v21 = vadd.f32 %v1241_v20, %v1240_v17  ;;  %v1243_v22 = vpop.f32.mrb[22].mxu0  ;;  %1307 = vmatmul.mubr.msk.f32.gmra.mrb[10].mxu1 %vm322_vm0, %v764_v18 }
 0x125   : > { %v1244_v24 = vpop.f32.mrb[23].mxu0 }
 0x126   : > { %v619_v26 = vadd.f32 %v1242_v21, %v410_v19  ;;  %v1245_v27 = vadd.f32 %v1244_v24, %v1243_v22 }
 0x127   : > { %v653_v28 = vld [vmem:[#allocation2 + $0x40] sm:$0xff] }
 0x128   : > { %636 = vst.msk [vmem:[#allocation2 + $0x50] sm:$0xff] %vm322_vm0, %v619_v26  ;;  %v620_v29 = vadd.f32 %v1245_v27, %v411_v23  ;;  %v765_v30 = vmul.f32 %v720_v25, %v653_v28 }
 0x129   : > { %v654_v32 = vld [vmem:[#allocation2 + $0x48] sm:$0xff] }
 0x12a   : > { %637 = vst.msk [vmem:[#allocation2 + $0x58] sm:$0xff] %vm322_vm0, %v620_v29  ;;  %v1246_v33 = vpop.f32.mrb[24].mxu0  ;;  %1309 = vmatprep.mubr.msk.f32.mxu1 %vm322_vm0, %v765_v30  ;;  %v766_v34 = vmul.f32 %v725_v31, %v654_v32 }
 0x12b   : > { %v1247_v36 = vpop.f32.mrb[25].mxu0 }
 0x12c   : > { %v1248_v38 = vadd.f32 %v1247_v36, %v1246_v33  ;;  %v1249_v39 = vpop.f32.mrb[26].mxu0  ;;  %1310 = vmatmul.mubr.msk.f32.gmra.mrb[12].mxu1 %vm322_vm0, %v766_v34 }
 0x12d   : > { %v1250_v41 = vpop.f32.mrb[27].mxu0 }
 0x12e   : > { %v621_v42 = vadd.f32 %v1248_v38, %v412_v35  ;;  %v1251_v43 = vadd.f32 %v1250_v41, %v1249_v39 }
 0x12f   : > { %v655_v45 = vld [vmem:[#allocation2 + $0x50] sm:$0xff] }
 0x130   : > { %638 = vst.msk [vmem:[#allocation2 + $0x60] sm:$0xff] %vm322_vm0, %v621_v42  ;;  %v622_v46 = vadd.f32 %v1251_v43, %v413_v40  ;;  %v767_v47 = vmul.f32 %v730_v37, %v655_v45 }
 0x131   : > { %v656_v48 = vld [vmem:[#allocation2 + $0x58] sm:$0xff] }
 0x132   : > { %639 = vst.msk [vmem:[#allocation2 + $0x68] sm:$0xff] %vm322_vm0, %v622_v46  ;;  %1312 = vmatprep.mubr.msk.f32.mxu1 %vm322_vm0, %v767_v47  ;;  %v768_v50 = vmul.f32 %v735_v44, %v656_v48 }
 0x134   : > { %1313 = vmatmul.mubr.msk.f32.gmra.mrb[14].mxu1 %vm322_vm0, %v768_v50 }
 0x137   : > { %v657_v52 = vld [vmem:[#allocation2 + $0x60] sm:$0xff] }
 0x138   : > { %v769_v55 = vmul.f32 %v740_v49, %v657_v52 }
 0x139   : > { %v658_v56 = vld [vmem:[#allocation2 + $0x68] sm:$0xff] }
 0x13a   : > { %1315 = vmatprep.mubr.msk.f32.mxu1 %vm322_vm0, %v769_v55  ;;  %v770_v58 = vmul.f32 %v745_v51, %v658_v56  ;;  %v991_v56 = vld [vmem:[%s313_s11] sm:$0x1] }
 0x13c   : > { %1316 = vmatmul.mubr.msk.f32.gmra.mrb[16].mxu1 %vm322_vm0, %v770_v58 }
 0x13d   : > { %1318 = vmatprep.mubr.msk.f32.mxu1 %vm322_vm0, %v771_v59 }
 0x140   : > { %1319 = vmatmul.mubr.msk.f32.gmra.mrb[18].mxu1 %vm322_vm0, %v772_v62 }
 0x141   : > { %1353 = vmatprep.mubr.msk.f32.mxu1 %vm1473_vm1, %v1471_v57 }
 0x1df   : > { %v1299_v1 = vpop.f32.mrb[4].mxu1 }
 0x1e0   : > { %v902_v2 = vadd.f32 %v1299_v1, %v1692_v0  ;;  %v896_v3 = vpop.f32.mrb[5].mxu1 }
 0x1e1   : > { %v897_v4 = vadd.f32 %v1692_v0, %v896_v3 }
 0x1e2   : > { %v976_v5 = vmax.f32 %v902_v2, 0.0 }
 0x1e3   : > { %v975_v6 = vmax.f32 %v897_v4, 0.0 }
 0x1e5   : > { %v1361_v7 = vpack.c.bf16 %v976_v5, %v975_v6 }
 0x1e7   : > { %v1302_v8 = vpop.f32.mrb[6].mxu1  ;;  %1362 = vmatpush3.bf16.msra.mxu1 %v1361_v7 }
 0x1e8   : > { %v912_v9 = vadd.f32 %v1302_v8, %v1692_v0  ;;  %v906_v10 = vpop.f32.mrb[7].mxu1  ;;  %1363 = vmatprep.subr.bf16.mxu1 %v1472_v63 }
 0x1e9   : > { %v907_v57 = vadd.f32 %v1692_v0, %v906_v10 }
 0x1ea   : > { %v978_v11 = vmax.f32 %v912_v9, 0.0 }
 0x1eb   : > { %v977_v12 = vmax.f32 %v907_v57, 0.0 }
 0x1ed   : > { %v1364_v13 = vpack.c.bf16 %v978_v11, %v977_v12 }
 0x1ef   : > { %v1305_v14 = vpop.f32.mrb[8].mxu1  ;;  %1365 = vmatpush3.bf16.msra.mxu1 %v1364_v13 }
 0x1f0   : > { %v922_v15 = vadd.f32 %v1305_v14, %v1692_v0  ;;  %v916_v16 = vpop.f32.mrb[9].mxu1  ;;  %1366 = vmatprep.subr.bf16.mxu1 %v1472_v63 }
 0x1f1   : > { %v917_v17 = vadd.f32 %v1692_v0, %v916_v16 }
 0x1f2   : > { %v980_v18 = vmax.f32 %v922_v15, 0.0 }
 0x1f3   : > { %v979_v19 = vmax.f32 %v917_v17, 0.0 }
 0x1f5   : > { %v1367_v20 = vpack.c.bf16 %v980_v18, %v979_v19 }
 0x1f7   : > { %v1308_v21 = vpop.f32.mrb[10].mxu1  ;;  %1368 = vmatpush3.bf16.msra.mxu1 %v1367_v20 }
 0x1f8   : > { %v932_v22 = vadd.f32 %v1308_v21, %v1692_v0  ;;  %v926_v23 = vpop.f32.mrb[11].mxu1  ;;  %1369 = vmatprep.subr.bf16.mxu1 %v1472_v63 }
 0x1f9   : > { %v927_v24 = vadd.f32 %v1692_v0, %v926_v23 }
 0x1fa   : > { %v982_v25 = vmax.f32 %v932_v22, 0.0 }
 0x1fb   : > { %v981_v26 = vmax.f32 %v927_v24, 0.0 }
 0x1fd   : > { %v1370_v27 = vpack.c.bf16 %v982_v25, %v981_v26 }
 0x1ff   : > { %v1311_v28 = vpop.f32.mrb[12].mxu1  ;;  %1371 = vmatpush3.bf16.msra.mxu1 %v1370_v27 }
 0x200   : > { %v942_v29 = vadd.f32 %v1311_v28, %v1692_v0  ;;  %v936_v30 = vpop.f32.mrb[13].mxu1  ;;  %1372 = vmatprep.subr.bf16.mxu1 %v1472_v63 }
 0x201   : > { %v937_v31 = vadd.f32 %v1692_v0, %v936_v30 }
 0x202   : > { %v984_v32 = vmax.f32 %v942_v29, 0.0 }
 0x203   : > { %v983_v33 = vmax.f32 %v937_v31, 0.0 }
 0x205   : > { %v1373_v34 = vpack.c.bf16 %v984_v32, %v983_v33 }
 0x207   : > { %v1314_v35 = vpop.f32.mrb[14].mxu1  ;;  %1374 = vmatpush3.bf16.msra.mxu1 %v1373_v34 }
 0x208   : > { %v952_v36 = vadd.f32 %v1314_v35, %v1692_v0  ;;  %v946_v37 = vpop.f32.mrb[15].mxu1  ;;  %1375 = vmatprep.subr.bf16.mxu1 %v1472_v63 }
 0x209   : > { %v947_v38 = vadd.f32 %v1692_v0, %v946_v37 }
 0x20a   : > { %v986_v39 = vmax.f32 %v952_v36, 0.0 }
 0x20b   : > { %v985_v40 = vmax.f32 %v947_v38, 0.0 }
 0x20d   : > { %v1376_v41 = vpack.c.bf16 %v986_v39, %v985_v40 }
 0x20f   : > { %v1317_v42 = vpop.f32.mrb[16].mxu1  ;;  %1377 = vmatpush3.bf16.msra.mxu1 %v1376_v41 }
 0x210   : > { %v962_v43 = vadd.f32 %v1317_v42, %v1692_v0  ;;  %v956_v44 = vpop.f32.mrb[17].mxu1  ;;  %1378 = vmatprep.subr.bf16.mxu1 %v1472_v63 }
 0x211   : > { %v957_v45 = vadd.f32 %v1692_v0, %v956_v44 }
 0x212   : > { %v988_v46 = vmax.f32 %v962_v43, 0.0 }
 0x213   : > { %v987_v47 = vmax.f32 %v957_v45, 0.0  ;;  %v1320_v48 = vpop.f32.mrb[18].mxu1 }
 0x214   : > { %v972_v49 = vadd.f32 %v1320_v48, %v1692_v0  ;;  %v966_v50 = vpop.f32.mrb[19].mxu1 }
 0x215   : > { %v1379_v51 = vpack.c.bf16 %v988_v46, %v987_v47  ;;  %v967_v52 = vadd.f32 %v1692_v0, %v966_v50 }
 0x216   : > { %v990_v53 = vmax.f32 %v972_v49, 0.0 }
 0x217   : > { %v989_v54 = vmax.f32 %v967_v52, 0.0  ;;  %1380 = vmatpush3.bf16.msra.mxu1 %v1379_v51 }
 0x218   : > { %1381 = vmatprep.subr.bf16.mxu1 %v1472_v63 }
 0x219   : > { %v1382_v55 = vpack.c.bf16 %v990_v53, %v989_v54 }
 0x21b   : > { %1383 = vmatpush3.bf16.msra.mxu1 %v1382_v55 }
 0x21e   : > { %1354 = vmatmul.mubr.f32.vlgmr.msra.gmra.mrb[20].mxu1 %v991_v56 }
 0x2f1   : > { %v1058_v58 = vpop.f32.mrb[20].mxu1 }
 0x2f2   : > { %1063 = vst.msk [vmem:[%s316_s14] sm:$0x1] %vm1062_vm2, %v1058_v58  ;;  %v1355_v59 = vpop.f32.mrb[21].mxu1 }
 0x2f3 PF: > { %s16_s23 = sadd.s32 1, %s1468_s23   ;;  %s1741_s21 = smov %s1464_s22 }
 0x2f4   : > { %p13_p7 = scmp.ge.s32.totalorder %s16_s23, 4   ;;  %s1742_s22 = smov %s1744_s24 }
 0x2f6   :  { %15 = sbr.rel (!%p13_p7) target bundleno = 2 (0x2), region = 89 }

</bundles_post_ra>
